<compile_context>
chip_gen: v7x
topology: tpu7x:2x2x1
jax: 0.10.0
libtpu: 0.0.40
codegen_flags: <defaults>
</compile_context>

<pallas_src>
import functools

import jax
import jax.numpy as jnp
from jax.experimental import pallas as pl
from jax.experimental.pallas import tpu as pltpu


def _moco_loss_kernel(logits_ref, targets_ref, row_ref, *, inner):
    x = logits_ref[...].astype(jnp.float32)          # (TN, Q)
    t = targets_ref[...].astype(jnp.float32)         # (TN, Q)

    # Max-subtracted softmax pieces (per-row log / per-element exp only).
    m = jnp.max(x, axis=1, keepdims=True)            # (TN, 1)
    e = jnp.exp(x - m)                                # (TN, Q)
    z = e.sum(axis=1, keepdims=True)                  # shifted partition fn
    lse = jnp.log(z) + m                              # logsumexp(x) per row
    t_sum = t.sum(axis=1, keepdims=True)              # (TN, 1)

    if inner:
        # -log( sum(p*t) / t_sum ), p = exp(x)/Z
        #   = log(z) + log(t_sum) - log( sum(exp(x-m) * t) )
        row = jnp.log(z) + jnp.log(t_sum) - jnp.log(
            (e * t).sum(axis=1, keepdims=True))
    else:
        # -sum(t * log p) / t_sum = lse - sum(t*x) / t_sum
        row = lse - (t * x).sum(axis=1, keepdims=True) / t_sum

    row_ref[...] = row                                # (TN, 1)


def _pick_tile_n(n, q, *, budget_bytes=24 << 20, max_tile=1024):
    """Largest batch tile whose double-buffered f32 inputs fit the VMEM budget."""
    per_row_bytes = 2 * 2 * q * 4          # 2 inputs x 2 pipeline buffers x f32
    t = budget_bytes // per_row_bytes
    t = min(t, max_tile, ((n + 7) // 8) * 8)
    t = max(8, (t // 8) * 8)               # keep sublane (8) alignment
    return int(t)


def label_moco_loss(logits, targets, *, inner=False, tile_n=None):
    """Pallas implementation of LabelMoCoLoss.forward. Returns a scalar f32."""
    n, q = logits.shape
    assert targets.shape == (n, q)

    if tile_n is None:
        tile_n = _pick_tile_n(n, q)

    # Pad the batch to a multiple of tile_n with benign rows (logits=0,
    # targets with one positive so t_sum>0); padded rows are dropped before
    # the final mean.
    n_pad = pl.cdiv(n, tile_n) * tile_n
    if n_pad != n:
        pad = n_pad - n
        logits = jnp.concatenate(
            [logits, jnp.zeros((pad, q), logits.dtype)], axis=0)
        pad_t = jnp.zeros((pad, q), targets.dtype)
        pad_t = pad_t.at[:, 0].set(jnp.ones((), targets.dtype))
        targets = jnp.concatenate([targets, pad_t], axis=0)

    kernel = functools.partial(_moco_loss_kernel, inner=inner)

    # Raise the scoped VMEM limit to cover the double-buffered tiles plus
    # headroom, but stay well under v7x's 64 MiB physical VMEM.
    vmem_in_bytes = 2 * 2 * tile_n * q * 4
    vmem_limit = int(min(max(vmem_in_bytes + (8 << 20), 32 << 20), 48 << 20))

    row = pl.pallas_call(
        kernel,
        out_shape=jax.ShapeDtypeStruct((n_pad, 1), jnp.float32),
        grid_spec=pltpu.PrefetchScalarGridSpec(
            num_scalar_prefetch=0,
            grid=(n_pad // tile_n,),
            in_specs=[
                pl.BlockSpec((tile_n, q), lambda i: (i, 0)),
                pl.BlockSpec((tile_n, q), lambda i: (i, 0)),
            ],
            out_specs=pl.BlockSpec((tile_n, 1), lambda i: (i, 0)),
        ),
        compiler_params=pltpu.CompilerParams(
            dimension_semantics=("parallel",),
            vmem_limit_bytes=vmem_limit,
        ),
    )(logits, targets)

    return jnp.sum(row[:n, 0]) / jnp.float32(n)


def _reference(logits, targets, inner):
    """Pure-JAX reference mirroring the PyTorch module."""
    e = jnp.exp(logits.astype(jnp.float32))
    t = targets.astype(jnp.float32)
    p = e / e.sum(axis=1, keepdims=True)
    if inner:
        row = -jnp.log((p * t).sum(axis=1) / t.sum(axis=1))
    else:
        row = -(jnp.log(p) * t).sum(axis=1) / t.sum(axis=1)
    return row.mean()


if __name__ == "__main__":
    key = jax.random.PRNGKey(0)

    ok = True
    for (N, Q) in ((8, 128), (20, 256)):   # second case exercises batch padding
        k1, k2, key = jax.random.split(key, 3)
        logits = jax.random.normal(k1, (N, Q), dtype=jnp.float32)
        # binary label-match indicators; guarantee at least one positive per row
        targets = (jax.random.uniform(k2, (N, Q)) < 0.3).astype(jnp.float32)
        targets = targets.at[:, 0].set(1.0)

        for inner in (False, True):
            out = label_moco_loss(logits, targets, inner=inner)
            out = jax.block_until_ready(out)
            ref = _reference(logits, targets, inner)
            if not jnp.allclose(out, ref, rtol=1e-5, atol=1e-5):
                ok = False
                print(f"MISMATCH N={N} Q={Q} inner={inner}: kernel={out} ref={ref}")

    if ok:
        print("KERNEL_OK")
</pallas_src>

<mosaic_0001>
module attributes {stable_mosaic.version = 11 : i64} {
  func.func @_moco_loss_kernel(%arg0: i32, %arg1: memref<8x128xf32, #tpu.memory_space<vmem>>, %arg2: memref<8x128xf32, #tpu.memory_space<vmem>>, %arg3: memref<8x1xf32, #tpu.memory_space<vmem>>) attributes {dimension_semantics = [#tpu.dimension_semantics<parallel>], iteration_bounds = array<i64: 1>, scalar_prefetch = 0 : i64, scratch_operands = 0 : i64, tpu.core_type = #tpu.core_type<tc>, window_params = [{transform_indices = @transform_0, window_bounds = array<i64: 8, 128>}, {transform_indices = @transform_1, window_bounds = array<i64: 8, 128>}, {transform_indices = @transform_2, window_bounds = array<i64: 8, 1>}]} {
    %c0 = arith.constant 0 : index
    %c0_0 = arith.constant 0 : index
    %0 = vector.load %arg1[%c0, %c0_0] : memref<8x128xf32, #tpu.memory_space<vmem>>, vector<8x128xf32>
    %c0_1 = arith.constant 0 : index
    %c0_2 = arith.constant 0 : index
    %1 = vector.load %arg2[%c0_1, %c0_2] : memref<8x128xf32, #tpu.memory_space<vmem>>, vector<8x128xf32>
    %cst = arith.constant dense<0xFF800000> : vector<8xf32>
    %2 = vector.multi_reduction <maximumf>, %0, %cst [1] : vector<8x128xf32> to vector<8xf32>
    %3 = vector.shape_cast %2 : vector<8xf32> to vector<8x1xf32>
    %4 = vector.broadcast %3 : vector<8x1xf32> to vector<8x128xf32>
    %5 = arith.subf %0, %4 : vector<8x128xf32>
    %6 = math.exp %5 : vector<8x128xf32>
    %cst_3 = arith.constant dense<0.000000e+00> : vector<8xf32>
    %7 = vector.multi_reduction <add>, %6, %cst_3 [1] : vector<8x128xf32> to vector<8xf32>
    %8 = vector.shape_cast %7 : vector<8xf32> to vector<8x1xf32>
    %9 = math.log %8 : vector<8x1xf32>
    %10 = arith.addf %9, %3 : vector<8x1xf32>
    %cst_4 = arith.constant dense<0.000000e+00> : vector<8xf32>
    %11 = vector.multi_reduction <add>, %1, %cst_4 [1] : vector<8x128xf32> to vector<8xf32>
    %12 = vector.shape_cast %11 : vector<8xf32> to vector<8x1xf32>
    %13 = arith.mulf %1, %0 : vector<8x128xf32>
    %cst_5 = arith.constant dense<0.000000e+00> : vector<8xf32>
    %14 = vector.multi_reduction <add>, %13, %cst_5 [1] : vector<8x128xf32> to vector<8xf32>
    %15 = vector.shape_cast %14 : vector<8xf32> to vector<8x1xf32>
    %16 = arith.divf %15, %12 : vector<8x1xf32>
    %17 = arith.subf %10, %16 : vector<8x1xf32>
    %c0_6 = arith.constant 0 : index
    %c0_7 = arith.constant 0 : index
    %18 = vector.load %arg3[%c0_6, %c0_7] : memref<8x1xf32, #tpu.memory_space<vmem>>, vector<8x1xf32>
    tpu.vector_store %arg3[%c0_6, %c0_7], %17 {strides = array<i32>} : memref<8x1xf32, #tpu.memory_space<vmem>>, vector<8x1xf32>,
    return
  }
  func.func @transform_0(%arg0: i32) -> (i32, i32) {
    %c0_i32 = arith.constant 0 : i32
    %c0_i32_0 = arith.constant 0 : i32
    return %arg0, %c0_i32 : i32, i32
  }
  func.func @transform_1(%arg0: i32) -> (i32, i32) {
    %c0_i32 = arith.constant 0 : i32
    %c0_i32_0 = arith.constant 0 : i32
    return %arg0, %c0_i32 : i32, i32
  }
  func.func @transform_2(%arg0: i32) -> (i32, i32) {
    %c0_i32 = arith.constant 0 : i32
    %c0_i32_0 = arith.constant 0 : i32
    return %arg0, %c0_i32 : i32, i32
  }
}

</mosaic_0001>

<bundles_post_ra>
// kernel: tpu_custom_call.1
= control target key start
LH: loop header
LB: loop body
LE: loop exit
PB: predicated region body
PF: predicated region fallthrough
CT: control target
= control target key end

     0   :  { %7 = vsyncpa [#allocation3], 0  ;;  %s163_s0 = inlined_call_operand.hbm [shape: f32[8,128], index: 0, kind: input, shape index: {}]   ;;  %s164_s1 = inlined_call_operand.hbm [shape: f32[8,128], index: 1, kind: input, shape index: {}]   ;;  %s165_s2 = inlined_call_operand.vmem [shape: f32[8,1], index: 2, kind: output, shape index: {}]  }
   0x1   :  { %8 = vsyncpa [#allocation5], 0  ;;  %s119_s9 = smov [#allocation2]   ;;  %s120_s11 = smov [#allocation4]  }
   0x2   :  { %s15_s10 = sshll.u32 %s119_s9, 4  ;;  %s25_s12 = sshll.u32 %s120_s11, 4  ;;  %s16_s10 = int_to_ptr.vmem [resolvable:$true] %s15_s10  ;;  %s26_s12 = int_to_ptr.vmem [resolvable:$true] %s25_s12 }
   0x3   :  { %s71_s15 = scalar_lea.hbm %s163_s0, 128 }
   0x4   :  { %p72_p0 = scmp.ne.s32.totalorder %s163_s0, %s71_s15  ;;  %p75_p1 = scmp.lt.u32.totalorder %s71_s15, %s163_s0 }
   0x6   :  { %p77_p2 = pnand %p75_p1, %p72_p0 }
   0x8   :  { %80 = shalt.err (!%p77_p2)
}
   0x9   :  { %s81_s20 = scalar_lea.vmem %s16_s10, 128  ;;  %p86_p4 = scmp.lt.s32.totalorder %s16_s10, %s16_s10 }
   0xa   :  { %p82_p3 = scmp.ne.s32.totalorder %s16_s10, %s81_s20  ;;  %p87_p5 = scmp.lt.s32.totalorder %s81_s20, %s81_s20 }
   0xc   :  { %p88_p6 = por %p87_p5, %p86_p4 }
   0xe   :  { %p89_p7 = pnand %p88_p6, %p82_p3 }
  0x10   :  { %92 = shalt.err (!%p89_p7)
}
  0x11   :  { %18 = dma.hbm_to_vmem [thread:$0]  %s163_s0, 128, %s16_s10, [#allocation3]  }
  0x12   :  { %s93_s25 = scalar_lea.hbm %s164_s1, 128 }
  0x13   :  { %p94_p8 = scmp.ne.s32.totalorder %s164_s1, %s93_s25  ;;  %p97_p9 = scmp.lt.u32.totalorder %s93_s25, %s164_s1 }
  0x15   :  { %p99_p10 = pnand %p97_p9, %p94_p8 }
  0x17   :  { %102 = shalt.err (!%p99_p10)
}
  0x18   :  { %s103_s30 = scalar_lea.vmem %s26_s12, 128  ;;  %p108_p12 = scmp.lt.s32.totalorder %s26_s12, %s26_s12 }
  0x19   :  { %p104_p11 = scmp.ne.s32.totalorder %s26_s12, %s103_s30  ;;  %p109_p13 = scmp.lt.s32.totalorder %s103_s30, %s103_s30 }
  0x1b   :  { %p110_p0 = por %p109_p13, %p108_p12 }
  0x1d   :  { %p111_p1 = pnand %p110_p0, %p104_p11 }
  0x1f   :  { %114 = shalt.err (!%p111_p1)
}
  0x20   :  { %28 = dma.hbm_to_vmem [thread:$0]  %s164_s1, 128, %s26_s12, [#allocation5]  }
  0x21   :  { %115 = dma.done.wait [#allocation3], 128  }
  0x22   :  { %116 = vsyncadd [#allocation3], 4294967168 }
  0x23   :  { %117 = dma.done.wait [#allocation5], 128  }
  0x24   :  { %118 = vsyncadd [#allocation5], 4294967168  ;;  %v35_v0 = vld [vmem:[#allocation2] sm:$0xff]  ;;  %v36_v1 = vld [vmem:[#allocation4] sm:$0xff]  ;;  %vm55_vm0 = vcmask 7168  }
  0x25   :  { %37 = vmax.xlane.f32.xlu0 %v35_v0  ;;  %47 = vadd.xlane.f32.xlu1 %v36_v1  ;;  %v49_v2 = vmul.f32 %v36_v1, %v35_v0 }
  0x29   :  { %50 = vadd.xlane.f32.xlu1 %v49_v2 }
  0xb2   :  { %v38_v3 = vpop.xlane.xlu0 %37  ;;  %v48_v7 = vpop.xlane.xlu1 %47 }
  0xb3   :  { %v39_v4 = vsub.f32 %v35_v0, %v38_v3 }
  0xb5   :  { %v40_v5 = vmul.f32 1.442695, %v39_v4 }
  0xb6   :  { %v51_v10 = vpop.xlane.xlu1 %50 }
  0xb7   :  { %65 = vpow2.f32 %v40_v5 }
  0xb8   :  { %67 = vrcp.f32 %v48_v7 }
  0xc1   :  { %v66_v6 = vpop.eup %65 }
  0xc2   :  { %42 = vadd.xlane.f32.xlu0 %v66_v6  ;;  %v68_v9 = vpop.eup %67 }
  0xc3   :  { %v53_v13 = vmul.f32 %v68_v9, %v51_v10 }
 0x14f   :  { %v43_v8 = vpop.xlane.xlu0 %42 }
 0x150   :  { %69 = vlog2.f32 %v43_v8 }
 0x15a   :  { %v70_v11 = vpop.eup %69 }
 0x15b   :  { %v45_v12 = vmul.f32 0.6931472, %v70_v11 }
 0x15d   :  { %v46_v14 = vadd.f32 %v45_v12, %v38_v3 }
 0x15f   :  { %v54_v15 = vsub.f32 %v46_v14, %v53_v13 }
 0x161   :  { %56 = vst.msk [vmem:[%s165_s2] sm:$0xff] %vm55_vm0, %v54_v15 }
 0x162   :  { %61 = vsyncpa [#allocation3], 1 }
 0x163   :  { %62 = vsyncpa [#allocation5], 1 }

</bundles_post_ra>
